<compile_context>
chip_gen: v7x
topology: tpu7x:2x2x1
jax: 0.10.0
libtpu: 0.0.40
codegen_flags: <defaults>
</compile_context>

<pallas_src>
import math

import jax
import jax.numpy as jnp
from jax.experimental import pallas as pl
from jax.experimental.pallas import tpu as pltpu


# ---------------- Pallas kernels -------------------------------------------

def stats_kernel(x_ref, sxx_ref, sx_ref):
    """Pass 1: per-tile Gram stats of the folded input (pure x read stream).

    Sxx = x^T x and sx = sum_rows(x) are enough to reconstruct the per-channel
    sum / sum-of-squares of y = x @ W in the wrapper, so neither y nor the
    weight is needed here.
    """
    gf = x_ref[...].astype(jnp.float32)                   # (tm_f, k_lane)
    sxx_ref[...] = jnp.dot(gf.T, gf, preferred_element_type=jnp.float32)
    s = jnp.sum(gf, axis=0, keepdims=True)                # (1, k_lane)
    # Broadcast across the 8-sublane block so the store is a plain aligned
    # block store; the wrapper reads row 0 of each tile.
    sx_ref[...] = jnp.broadcast_to(s, sx_ref.shape)


def conv_bn_relu_kernel(x_ref, w_ref, scale_ref, shift_ref, o_ref):
    # Fused 1x1 conv (folded bf16 matmul, f32 accumulation) + BN affine + ReLU.
    y = jnp.dot(x_ref[...], w_ref[...], preferred_element_type=jnp.float32)
    o_ref[...] = jnp.maximum(y * scale_ref[...] + shift_ref[...], 0.0)


# ---------------- Wrapper ----------------------------------------------------

def _fold_factor(c_in, c_out, max_weight_bytes=4 << 20):
    """Rows-per-lane-group G so G*Cin and G*Cout are multiples of 128."""
    g_in = 128 // math.gcd(128, c_in)
    g_out = 128 // math.gcd(128, c_out)
    g = max(g_in, g_out)            # both divide 128 -> lcm == max
    # Keep the folded block-diagonal weight small; prefer output-lane density.
    if (g * c_in) * (g * c_out) * 2 > max_weight_bytes:
        g = g_out
    if (g * c_in) * (g * c_out) * 2 > max_weight_bytes:
        g = 1
    return g


def conv2d_forward(x, weight, bias, gamma, beta, *, eps=1e-5,
                   vmem_tile_budget=24 * 1024 * 1024,
                   vmem_limit_bytes=48 * 1024 * 1024):
    """x: (B, T, V, Cin).  weight: (Cout, Cin, 1, 1).  Returns (B, T, V, Cout) f32."""
    B, T, V, Cin = x.shape
    Cout = weight.shape[0]
    M = B * T * V

    # ---- Lane-density fold --------------------------------------------------
    G = _fold_factor(Cin, Cout)
    k_lane = G * Cin            # multiple of 128 (and of 8) for all GMAN dims
    c_lane = G * Cout

    # ---- VMEM-budget-derived row tile ---------------------------------------
    # Pass-2 per-row VMEM: x bf16 double-buffered (4*Cin B) + out f32
    # double-buffered (8*Cout B) + f32 matmul/affine temps (~8*Cout B).
    align = 16 * G                                  # bf16 sublane rule on folded x
    bytes_per_row = 4 * Cin + 16 * Cout
    tile_m = vmem_tile_budget // bytes_per_row
    tile_m = max(align, (tile_m // align) * align)
    rows_needed = pl.cdiv(M, align) * align
    if rows_needed >= 2 * align:
        # Keep >= 2 grid tiles so the 'parallel' axis can split across the two
        # TensorCores on v7x (harmless on v5e/v6e).
        tile_m = min(tile_m, pl.cdiv(rows_needed // 2, align) * align)
    tile_m = min(tile_m, rows_needed)
    M_pad = pl.cdiv(M, tile_m) * tile_m
    n_tiles = M_pad // tile_m
    tm_f = tile_m // G                              # folded rows per tile (mult of 16)

    # ---- Operands (bf16 reads halve x traffic; accumulation stays f32) ------
    x2 = x.reshape(M, Cin).astype(jnp.bfloat16)
    if M_pad != M:
        # Zero rows contribute exactly zero to the Gram stats (and the conv
        # bias is dropped), so BN is unperturbed; we divide by the true M.
        x2 = jnp.pad(x2, ((0, M_pad - M), (0, 0)))
    x_fold = x2.reshape(M_pad // G, k_lane)

    # Effective (bf16-rounded) conv weight as a (Cin, Cout) matmul; the stats
    # epilogue uses the same rounded weight so stats match the pass-2 conv.
    w_eff = weight.reshape(Cout, Cin).T.astype(jnp.bfloat16).astype(jnp.float32)
    if G > 1:
        # G-block-diagonal expansion: folded matmul is lane-dense on both the
        # contraction (k_lane) and output (c_lane) axes.
        w_big = (jnp.eye(G, dtype=jnp.float32)[:, None, :, None]
                 * w_eff[None, :, None, :]).reshape(k_lane, c_lane)
    else:
        w_big = w_eff
    w_big = w_big.astype(jnp.bfloat16)

    # Conv bias cancels exactly under training-mode BatchNorm (y - mean).
    del bias

    cparams = pltpu.CompilerParams(
        dimension_semantics=("parallel",),
        vmem_limit_bytes=vmem_limit_bytes,
    )

    # ---- Pass 1: per-tile Gram stats (x^T x, sum x) -------------------------
    sxx_p, sx_p = pl.pallas_call(
        stats_kernel,
        out_shape=(
            jax.ShapeDtypeStruct((n_tiles * k_lane, k_lane), jnp.float32),
            jax.ShapeDtypeStruct((n_tiles * 8, k_lane), jnp.float32),
        ),
        grid_spec=pltpu.PrefetchScalarGridSpec(
            num_scalar_prefetch=0,
            grid=(n_tiles,),
            in_specs=[pl.BlockSpec((tm_f, k_lane), lambda i: (i, 0))],
            out_specs=(
                pl.BlockSpec((k_lane, k_lane), lambda i: (i, 0)),
                pl.BlockSpec((8, k_lane), lambda i: (i, 0)),
            ),
        ),
        compiler_params=cparams,
    )(x_fold)

    # ---- Tiny wrapper epilogue: BN batch mean/var -> scale/shift ------------
    sxx_fold = sxx_p.reshape(n_tiles, k_lane, k_lane).sum(axis=0)      # (k_lane, k_lane)
    sx_fold = sx_p.reshape(n_tiles, 8, k_lane)[:, 0, :].sum(axis=0)    # (k_lane,)
    idx = jnp.arange(G)
    # Sum of the G diagonal (Cin, Cin) blocks = x^T x over all original rows.
    sxx_c = sxx_fold.reshape(G, Cin, G, Cin)[idx, :, idx, :].sum(axis=0)
    sx_c = sx_fold.reshape(G, Cin).sum(axis=0)                          # (Cin,)

    m = jnp.float32(M)
    sums_c = sx_c @ w_eff                                  # (Cout,)  sum_r y
    sqs_c = jnp.sum(w_eff * (sxx_c @ w_eff), axis=0)       # (Cout,)  sum_r y^2
    mean = sums_c / m
    var = jnp.maximum(sqs_c / m - mean * mean, 0.0)        # clamp cancellation noise
    scale = gamma.astype(jnp.float32) * jax.lax.rsqrt(var + eps)
    shift = beta.astype(jnp.float32) - mean * scale
    scale_lane = jnp.tile(scale.reshape(1, Cout), (1, G))  # (1, c_lane)
    shift_lane = jnp.tile(shift.reshape(1, Cout), (1, G))

    # ---- Pass 2: recompute conv, fuse BN affine + ReLU, lane-dense store ----
    # TODO(synk): output kept f32 to match the PyTorch module; emit bf16 here
    # if the downstream GMAN consumer tolerates it (halves the dominant write).
    out_fold = pl.pallas_call(
        conv_bn_relu_kernel,
        out_shape=jax.ShapeDtypeStruct((M_pad // G, c_lane), jnp.float32),
        grid_spec=pltpu.PrefetchScalarGridSpec(
            num_scalar_prefetch=0,
            grid=(n_tiles,),
            in_specs=[
                pl.BlockSpec((tm_f, k_lane), lambda i: (i, 0)),
                pl.BlockSpec((k_lane, c_lane), lambda i: (0, 0)),
                pl.BlockSpec((1, c_lane), lambda i: (0, 0)),
                pl.BlockSpec((1, c_lane), lambda i: (0, 0)),
            ],
            out_specs=pl.BlockSpec((tm_f, c_lane), lambda i: (i, 0)),
        ),
        compiler_params=cparams,
    )(x_fold, w_big, scale_lane, shift_lane)

    out2 = out_fold.reshape(M_pad, Cout)[:M]
    return out2.reshape(B, T, V, Cout)


# ---------------- Parameter init (deterministic, matches __init__) -----------

def init_params(key, c_in, c_out):
    # Xavier uniform conv weight (Cout, Cin, 1, 1); zero bias; BN gamma=1, beta=0.
    limit = math.sqrt(6.0 / (c_in + c_out))
    w = jax.random.uniform(key, (c_out, c_in, 1, 1), jnp.float32, -limit, limit)
    b = jnp.zeros((c_out,), jnp.float32)
    gamma = jnp.ones((c_out,), jnp.float32)
    beta = jnp.zeros((c_out,), jnp.float32)
    return w, b, gamma, beta


# TODO(synk): the 'SAME' padding branch (math.ceil on a tuple) is unreachable /
# erroneous in the original PyTorch code; only the 1x1 'VALID' path GMAN uses
# is implemented.  BatchNorm running-stat buffers are not tracked (they do not
# affect the training-mode forward output).

if __name__ == "__main__":
    B, T, V, C_IN, C_OUT = 2, 8, 16, 4, 32   # (batch, num_step, num_vertex, D)

    key = jax.random.PRNGKey(0)
    kx, kw = jax.random.split(key)
    x = jax.random.normal(kx, (B, T, V, C_IN), jnp.float32)
    w, b, gamma, beta = init_params(kw, C_IN, C_OUT)

    out = conv2d_forward(x, w, b, gamma, beta)
    out = jax.block_until_ready(out)
    assert out.shape == (B, T, V, C_OUT)

    # Reference 1: exact module semantics in f32 (loose tolerance covers the
    # bf16 matmul operands the kernel uses to halve HBM traffic).
    x2 = x.reshape(-1, C_IN)
    y_ref = x2 @ w.reshape(C_OUT, C_IN).T + b[None, :]
    mean = y_ref.mean(axis=0, keepdims=True)
    var = ((y_ref - mean) ** 2).mean(axis=0, keepdims=True)
    ref32 = jnp.maximum((y_ref - mean) * jax.lax.rsqrt(var + 1e-5) * gamma + beta, 0.0)
    ref32 = ref32.reshape(B, T, V, C_OUT)
    assert jnp.allclose(out, ref32, atol=3e-2, rtol=3e-2)

    # Reference 2: same math with bf16-rounded operands (tight tolerance —
    # validates the fold / Gram-stats / fusion logic itself).
    xb = x2.astype(jnp.bfloat16).astype(jnp.float32)
    wb = w.reshape(C_OUT, C_IN).T.astype(jnp.bfloat16).astype(jnp.float32)
    y_b = xb @ wb
    mean_b = y_b.mean(axis=0, keepdims=True)
    var_b = ((y_b - mean_b) ** 2).mean(axis=0, keepdims=True)
    ref_b = jnp.maximum((y_b - mean_b) * jax.lax.rsqrt(var_b + 1e-5) * gamma + beta, 0.0)
    ref_b = ref_b.reshape(B, T, V, C_OUT)
    assert jnp.allclose(out, ref_b, atol=2e-3, rtol=2e-3)

    print("KERNEL_OK")
</pallas_src>

<mosaic_0001>
module attributes {stable_mosaic.version = 11 : i64} {
  func.func @stats_kernel(%arg0: i32, %arg1: memref<16x128xbf16, #tpu.memory_space<vmem>>, %arg2: memref<128x128xf32, #tpu.memory_space<vmem>>, %arg3: memref<8x128xf32, #tpu.memory_space<vmem>>) attributes {dimension_semantics = [#tpu.dimension_semantics<parallel>], iteration_bounds = array<i64: 1>, scalar_prefetch = 0 : i64, scratch_operands = 0 : i64, tpu.core_type = #tpu.core_type<tc>, window_params = [{transform_indices = @transform_0, window_bounds = array<i64: 16, 128>}, {transform_indices = @transform_1, window_bounds = array<i64: 128, 128>}, {transform_indices = @transform_2, window_bounds = array<i64: 8, 128>}]} {
    %c0 = arith.constant 0 : index
    %c0_0 = arith.constant 0 : index
    %0 = vector.load %arg1[%c0, %c0_0] : memref<16x128xbf16, #tpu.memory_space<vmem>>, vector<16x128xbf16>
    %1 = arith.extf %0 : vector<16x128xbf16> to vector<16x128xf32>
    %2 = tpu.transpose %1, [1, 0] : vector<16x128xf32> -> vector<128x16xf32>
    %cst = arith.constant dense<0.000000e+00> : vector<128x128xf32>
    %3 = tpu.matmul %2, %1, %cst {dimension_numbers = #tpu.dot_dimension_numbers<[1], [0], [0], [1], [0, 0, 1, 1], [], []>} : vector<128x16xf32>, vector<16x128xf32>, vector<128x128xf32> -> vector<128x128xf32>
    %c0_1 = arith.constant 0 : index
    %c0_2 = arith.constant 0 : index
    %4 = vector.load %arg2[%c0_1, %c0_2] : memref<128x128xf32, #tpu.memory_space<vmem>>, vector<128x128xf32>
    tpu.vector_store %arg2[%c0_1, %c0_2], %3 {strides = array<i32>} : memref<128x128xf32, #tpu.memory_space<vmem>>, vector<128x128xf32>,
    %cst_3 = arith.constant dense<0.000000e+00> : vector<128xf32>
    %5 = vector.multi_reduction <add>, %1, %cst_3 [0] : vector<16x128xf32> to vector<128xf32>
    %6 = vector.shape_cast %5 : vector<128xf32> to vector<1x128xf32>
    %7 = vector.shape_cast %6 : vector<1x128xf32> to vector<1x128xf32>
    %8 = vector.broadcast %7 : vector<1x128xf32> to vector<8x128xf32>
    %c0_4 = arith.constant 0 : index
    %c0_5 = arith.constant 0 : index
    %9 = vector.load %arg3[%c0_4, %c0_5] : memref<8x128xf32, #tpu.memory_space<vmem>>, vector<8x128xf32>
    tpu.vector_store %arg3[%c0_4, %c0_5], %8 {strides = array<i32>} : memref<8x128xf32, #tpu.memory_space<vmem>>, vector<8x128xf32>,
    return
  }
  func.func @transform_0(%arg0: i32) -> (i32, i32) {
    %c0_i32 = arith.constant 0 : i32
    %c0_i32_0 = arith.constant 0 : i32
    return %arg0, %c0_i32 : i32, i32
  }
  func.func @transform_1(%arg0: i32) -> (i32, i32) {
    %c0_i32 = arith.constant 0 : i32
    %c0_i32_0 = arith.constant 0 : i32
    return %arg0, %c0_i32 : i32, i32
  }
  func.func @transform_2(%arg0: i32) -> (i32, i32) {
    %c0_i32 = arith.constant 0 : i32
    %c0_i32_0 = arith.constant 0 : i32
    return %arg0, %c0_i32 : i32, i32
  }
}

</mosaic_0001>

<bundles_post_ra>
// kernel: tpu_custom_call.1
= control target key start
LH: loop header
LB: loop body
LE: loop exit
PB: predicated region body
PF: predicated region fallthrough
CT: control target
= control target key end

     0   :  { %8 = vsyncpa [#allocation3], 0  ;;  %s537_s0 = inlined_call_operand.hbm [shape: bf16[16,128], index: 0, kind: input, shape index: {}]   ;;  %s538_s1 = inlined_call_operand.hbm [shape: f32[128,128], index: 1, kind: output, shape index: {0}]   ;;  %s539_s2 = inlined_call_operand.hbm [shape: f32[8,128], index: 2, kind: output, shape index: {1}]  }
   0x1   :  { %9 = vsyncpa [#allocation4], 0 }
   0x2   :  { %10 = vsyncpa [#allocation7], 0  ;;  %s463_s9 = smov [#allocation2]   ;;  %s391_s13 = scalar_lea.hbm %s537_s0, 128 }
   0x3   :  { %s16_s10 = sshll.u32 %s463_s9, 4  ;;  %p392_p0 = scmp.ne.s32.totalorder %s537_s0, %s391_s13  ;;  %s17_s10 = int_to_ptr.vmem [resolvable:$true] %s16_s10 }
   0x4   :  { %p395_p1 = scmp.lt.u32.totalorder %s391_s13, %s537_s0 }
   0x6   :  { %p397_p2 = pnand %p395_p1, %p392_p0 }
   0x8   :  { %400 = shalt.err (!%p397_p2)
}
   0x9   :  { %s401_s18 = scalar_lea.vmem %s17_s10, 128  ;;  %p406_p4 = scmp.lt.s32.totalorder %s17_s10, %s17_s10 }
   0xa   :  { %p402_p3 = scmp.ne.s32.totalorder %s17_s10, %s401_s18  ;;  %p407_p5 = scmp.lt.s32.totalorder %s401_s18, %s401_s18 }
   0xc   :  { %p408_p6 = por %p407_p5, %p406_p4 }
   0xe   :  { %p409_p7 = pnand %p408_p6, %p402_p3 }
  0x10   :  { %412 = shalt.err (!%p409_p7)
}
  0x11   :  { %s464_s19 = smov 64   ;;  %s465_s20 = smov 4  }
  0x12   :  { %22 = dma.hbm_to_vmem [thread:$0]  %s537_s0, 128, %s17_s10, [#allocation3], %s464_s19, %s464_s19, %s465_s20  }
  0x13   :  { %457 = dma.done.wait [#allocation3], 128  }
  0x14   :  { %458 = vsyncadd [#allocation3], 4294967168  ;;  %v328_v0 = vld [vmem:[#allocation2] sm:$0xff]   ;;  %vm62_vm0 = vcmask 130048   ;;  %s466_s0 = smov [#allocation6]  }
  0x15   :  { %v329_v1 = vunpack.c.l.bf16 %v328_v0  ;;  %v330_v2 = vunpack.c.h.bf16 %v328_v0  ;;  %378 = vmatprep.subr.bf16.mxu0 %v328_v0  ;;  %381 = vmatprep.subr.bf16.mxu1 %v328_v0  ;;  %s298_s23 = sshll.u32 %s466_s0, 4  ;;  %s299_s23 = int_to_ptr.vmem [resolvable:$true] %s298_s23 }
  0x16   :  { %380 = vmatpush3.bf16.msra.mxu0 %v328_v0  ;;  %382 = vmatpush3.bf16.msra.mxu1 %v328_v0  ;;  %s413_s24 = scalar_lea.vmem %s299_s23, 128  ;;  %p418_p9 = scmp.lt.s32.totalorder %s299_s23, %s299_s23 }
  0x17   :  { %30 = vxpose.xlu0.b32.start [1/2] (short) %v329_v1, 128  ;;  %v272_v3 = vadd.f32 %v330_v2, %v329_v1  ;;  %p414_p8 = scmp.ne.s32.totalorder %s299_s23, %s413_s24  ;;  %p419_p10 = scmp.lt.s32.totalorder %s413_s24, %s413_s24 }
  0x19   :  { %v273_v20 = vrot.slane %v272_v3, 4  ;;  %p420_p11 = por %p419_p10, %p418_p9 }
  0x1b   :  { %31 = vxpose.xlu0.b32.end [2/2] (short) %v330_v2, 128  ;;  %v274_v21 = vadd.f32 %v273_v20, %v272_v3  ;;  %p421_p12 = pnand %p420_p11, %p414_p8 }
  0x1d   :  { %v275_v22 = vrot.slane %v274_v21, 2 }
  0x1f   :  { %v276_v23 = vadd.f32 %v275_v22, %v274_v21 }
  0x21   :  { %v277_v24 = vrot.slane %v276_v23, 1 }
  0x23   :  { %v278_v25 = vadd.f32 %v277_v24, %v276_v23 }
  0x25   :  { %279 = vst [vmem:[#allocation6] sm:$0xff] %v278_v25 }
  0x97   :  { %v46_v4 = vpop.trf.xlu0 }
  0x98   :  { %353 = vmatprep.mubr.msk.f32.mxu0 %vm62_vm0, %v46_v4 }
  0x9b   :  { %v47_v5 = vpop.trf.xlu0 }
  0x9c   :  { %354 = vmatmul.mubr.msk.f32.vlgmr.msra.gmra.mrb[0].mxu0 %vm62_vm0, %v47_v5 }
  0x9f   :  { %v48_v6 = vpop.trf.xlu0 }
  0xa0   :  { %356 = vmatprep.mubr.msk.f32.mxu0 %vm62_vm0, %v48_v6 }
  0xa3   :  { %v49_v7 = vpop.trf.xlu0 }
  0xa4   :  { %357 = vmatmul.mubr.msk.f32.gmra.mrb[2].mxu0 %vm62_vm0, %v49_v7 }
  0xa7   :  { %v50_v8 = vpop.trf.xlu0 }
  0xa8   :  { %359 = vmatprep.mubr.msk.f32.mxu0 %vm62_vm0, %v50_v8 }
  0xab   :  { %v51_v9 = vpop.trf.xlu0 }
  0xac   :  { %360 = vmatmul.mubr.msk.f32.gmra.mrb[4].mxu0 %vm62_vm0, %v51_v9 }
  0xaf   :  { %v52_v10 = vpop.trf.xlu0 }
  0xb0   :  { %362 = vmatprep.mubr.msk.f32.mxu0 %vm62_vm0, %v52_v10 }
  0xb3   :  { %v53_v11 = vpop.trf.xlu0 }
  0xb4   :  { %363 = vmatmul.mubr.msk.f32.gmra.mrb[6].mxu0 %vm62_vm0, %v53_v11 }
  0xb7   :  { %v54_v12 = vpop.trf.xlu0 }
  0xb8   :  { %365 = vmatprep.mubr.msk.f32.mxu1 %vm62_vm0, %v54_v12 }
  0xbb   :  { %v55_v13 = vpop.trf.xlu0 }
  0xbc   :  { %366 = vmatmul.mubr.msk.f32.vlgmr.msra.gmra.mrb[0].mxu1 %vm62_vm0, %v55_v13 }
  0xbf   :  { %v56_v14 = vpop.trf.xlu0 }
  0xc0   :  { %368 = vmatprep.mubr.msk.f32.mxu1 %vm62_vm0, %v56_v14 }
  0xc3   :  { %v57_v15 = vpop.trf.xlu0 }
  0xc4   :  { %369 = vmatmul.mubr.msk.f32.gmra.mrb[2].mxu1 %vm62_vm0, %v57_v15 }
  0xc7   :  { %v58_v16 = vpop.trf.xlu0 }
  0xc8   :  { %371 = vmatprep.mubr.msk.f32.mxu1 %vm62_vm0, %v58_v16 }
  0xcb   :  { %v59_v17 = vpop.trf.xlu0 }
  0xcc   :  { %372 = vmatmul.mubr.msk.f32.gmra.mrb[4].mxu1 %vm62_vm0, %v59_v17 }
  0xcf   :  { %v60_v18 = vpop.trf.xlu0 }
  0xd0   :  { %374 = vmatprep.mubr.msk.f32.mxu1 %vm62_vm0, %v60_v18 }
  0xd3   :  { %v61_v19 = vpop.trf.xlu0 }
  0xd4   :  { %375 = vmatmul.mubr.msk.f32.gmra.mrb[6].mxu1 %vm62_vm0, %v61_v19 }
  0xd5   :  { %424 = shalt.err (!%p421_p12)
}
  0xd6   :  { %s425_s27 = scalar_lea.hbm %s539_s2, 128 }
  0xd7   :  { %p426_p13 = scmp.ne.s32.totalorder %s539_s2, %s425_s27  ;;  %p429_p0 = scmp.lt.u32.totalorder %s425_s27, %s539_s2 }
  0xd9   :  { %p431_p1 = pnand %p429_p0, %p426_p13 }
  0xdb   :  { %434 = shalt.err (!%p431_p1)
}
  0xdc   :  { %301 = dma.vmem_to_hbm [thread:$0]  %s299_s23, 128, %s539_s2, [#allocation7]  }
  0xdd   :  { %s467_s2 = smov [#allocation5]  }
  0xde   :  { %s285_s6 = sshll.u32 %s467_s2, 4  ;;  %s286_s6 = int_to_ptr.vmem [resolvable:$true] %s285_s6 }
  0xdf   :  { %s435_s7 = scalar_lea.vmem %s286_s6, 2048  ;;  %p440_p3 = scmp.lt.s32.totalorder %s286_s6, %s286_s6 }
  0xe0   :  { %p436_p2 = scmp.ne.s32.totalorder %s286_s6, %s435_s7  ;;  %p441_p4 = scmp.lt.s32.totalorder %s435_s7, %s435_s7 }
  0xe2   :  { %p442_p5 = por %p441_p4, %p440_p3 }
  0xe4   :  { %p443_p6 = pnand %p442_p5, %p436_p2 }
 0x16f   :  { %v355_v26 = vpop.f32.mrb[0].mxu0 }
 0x170   :  { %257 = vst [vmem:[#allocation5 + $0x8] sm:$0xff] %v355_v26  ;;  %v177_v27 = vpop.f32.mrb[1].mxu0 }
 0x171   :  { %256 = vst [vmem:[#allocation5] sm:$0xff] %v177_v27 }
 0x177   :  { %v358_v28 = vpop.f32.mrb[2].mxu0 }
 0x178   :  { %259 = vst [vmem:[#allocation5 + $0x18] sm:$0xff] %v358_v28  ;;  %v187_v29 = vpop.f32.mrb[3].mxu0 }
 0x179   :  { %258 = vst [vmem:[#allocation5 + $0x10] sm:$0xff] %v187_v29 }
 0x17f   :  { %v361_v30 = vpop.f32.mrb[4].mxu0 }
 0x180   :  { %261 = vst [vmem:[#allocation5 + $0x28] sm:$0xff] %v361_v30  ;;  %v197_v31 = vpop.f32.mrb[5].mxu0 }
 0x181   :  { %260 = vst [vmem:[#allocation5 + $0x20] sm:$0xff] %v197_v31 }
 0x187   :  { %v364_v32 = vpop.f32.mrb[6].mxu0 }
 0x188   :  { %263 = vst [vmem:[#allocation5 + $0x38] sm:$0xff] %v364_v32  ;;  %v207_v33 = vpop.f32.mrb[7].mxu0 }
 0x189   :  { %262 = vst [vmem:[#allocation5 + $0x30] sm:$0xff] %v207_v33 }
 0x18f   :  { %v367_v34 = vpop.f32.mrb[0].mxu1 }
 0x190   :  { %265 = vst [vmem:[#allocation5 + $0x48] sm:$0xff] %v367_v34  ;;  %v217_v35 = vpop.f32.mrb[1].mxu1 }
 0x191   :  { %264 = vst [vmem:[#allocation5 + $0x40] sm:$0xff] %v217_v35 }
 0x197   :  { %v370_v36 = vpop.f32.mrb[2].mxu1 }
 0x198   :  { %267 = vst [vmem:[#allocation5 + $0x58] sm:$0xff] %v370_v36  ;;  %v227_v37 = vpop.f32.mrb[3].mxu1 }
 0x199   :  { %266 = vst [vmem:[#allocation5 + $0x50] sm:$0xff] %v227_v37 }
 0x19f   :  { %v373_v38 = vpop.f32.mrb[4].mxu1 }
 0x1a0   :  { %269 = vst [vmem:[#allocation5 + $0x68] sm:$0xff] %v373_v38  ;;  %v237_v39 = vpop.f32.mrb[5].mxu1 }
 0x1a1   :  { %268 = vst [vmem:[#allocation5 + $0x60] sm:$0xff] %v237_v39 }
 0x1a7   :  { %v376_v40 = vpop.f32.mrb[6].mxu1 }
 0x1a8   :  { %271 = vst [vmem:[#allocation5 + $0x78] sm:$0xff] %v376_v40  ;;  %v247_v41 = vpop.f32.mrb[7].mxu1 }
 0x1a9   :  { %270 = vst [vmem:[#allocation5 + $0x70] sm:$0xff] %v247_v41 }
 0x1aa   :  { %446 = shalt.err (!%p443_p6)
}
 0x1ab   :  { %s447_s10 = scalar_lea.hbm %s538_s1, 2048 }
 0x1ac   :  { %p448_p7 = scmp.ne.s32.totalorder %s538_s1, %s447_s10  ;;  %p451_p8 = scmp.lt.u32.totalorder %s447_s10, %s538_s1 }
 0x1ae   :  { %p453_p9 = pnand %p451_p8, %p448_p7 }
 0x1b0   :  { %456 = shalt.err (!%p453_p9)
}
 0x1b1   :  { %s468_s15 = smov 128   ;;  %s469_s16 = smov 8  }
 0x1b2   :  { %291 = dma.vmem_to_hbm [thread:$0]  %s286_s6, 2048, %s538_s1, [#allocation4], %s468_s15, %s468_s15, %s469_s16  }
 0x1b3   :  { %459 = dma.done.wait [#allocation4], 2048  }
 0x1b4   :  { %460 = vsyncadd [#allocation4], 4294965248 }
 0x1b5   :  { %461 = dma.done.wait [#allocation7], 128  }
 0x1b6   :  { %462 = vsyncadd [#allocation7], 4294967168 }
 0x1b7   :  { %308 = vsyncpa [#allocation3], 1 }
 0x1b8   :  { %309 = vsyncpa [#allocation4], 1 }
 0x1b9   :  { %310 = vsyncpa [#allocation7], 1 }

</bundles_post_ra>
